<compile_context>
chip_gen: v6e
topology: v6e:2x2x1
jax: 0.10.0
libtpu: 0.0.40
codegen_flags: <defaults>
</compile_context>

<pallas_src>
import functools

import jax
import jax.numpy as jnp
from jax import lax
from jax.experimental import pallas as pl
from jax.experimental.pallas import tpu as pltpu


def _proj_kernel(x_ref, w_ref, o_ref):
    """(tm, K) @ (K, tn) -> (tm, tn) on the MXU; f32 accumulate, one downcast."""
    o_ref[...] = jnp.dot(
        x_ref[...], w_ref[...], preferred_element_type=jnp.float32
    ).astype(o_ref.dtype)


def _round_up(x, mult):
    return ((x + mult - 1) // mult) * mult


def _vmem_budget_bytes():
    """3/4 of physical per-core VMEM (~96 MiB v5e/v6e, ~48 MiB v7x)."""
    phys = 64 << 20  # conservative default (v7x-sized) if the query is unavailable
    try:
        info = pltpu.get_tpu_info()
        cap = getattr(info, "vmem_capacity_bytes", None)
        if cap:
            phys = int(cap)
    except Exception:
        pass
    return (phys * 3) // 4


def _choose_tiles(m, n_pad, k, in_itemsize, out_itemsize, budget):
    """Pick (tm, tn).

    Priority 1: grow tm toward covering all of M so the (K, N_pad) weight is
    streamed from HBM exactly once per call.
    Priority 2: a lane-dense tn (multiple of 128, 512 preferred) that still fits,
    leaving several N-steps to pipeline the weight DMA behind the MXU.
    """
    pack = max(8, 32 // in_itemsize)  # sublane pack: 8 f32, 16 bf16, 32 int8/fp8
    m_full = _round_up(m, pack)

    def blocks_fit(tm, tn):
        # Every operand block is double-buffered by the Pallas pipeline.
        return 2 * (tm * k + k * tn) * in_itemsize + 2 * tm * tn * out_itemsize <= budget

    # Largest tm <= m_full (pack-aligned) that fits alongside a minimal 128-wide tile.
    tm = m_full
    while tm > pack and not blocks_fit(tm, 128):
        tm = max(pack, _round_up(tm // 2, pack))
    # Balance M tiles (same number of weight passes, evener tiles).
    num_m = (m + tm - 1) // tm
    tm = min(m_full, _round_up((m + num_m - 1) // num_m, pack))

    # Widest preferred lane-dense tn that still fits.
    tn = 128
    for cand in (min(n_pad, 512), 256, 128):
        if cand <= n_pad and blocks_fit(tm, cand):
            tn = cand
            break
    return tm, min(tn, n_pad)


@functools.partial(jax.jit, static_argnames=("concat_factor", "compute_dtype"))
def detikzify_connector(image_hidden_states, proj_weight, *, concat_factor=3,
                        compute_dtype=None):
    """Forward pass of DetikzifyConnector.

    Args:
      image_hidden_states: (B, S, Dv) array.
      proj_weight: (Dout, Dv * concat_factor) array — PyTorch nn.Linear weight
                   layout (out_features, in_features), bias-free.
      concat_factor: sequence-concatenation factor.
      compute_dtype: matmul operand dtype.  None (default) = bf16 when the input
                     is f32 (standard connector numerics), otherwise input dtype.

    Returns:
      (B, S // concat_factor, Dout) array in the input dtype.
    """
    bsz, seq, embed_dim = image_hidden_states.shape
    if seq % concat_factor != 0:
        raise ValueError("sequence length must be divisible by concat_factor")
    new_seq = seq // concat_factor
    in_dim = embed_dim * concat_factor
    out_dim = proj_weight.shape[0]
    if proj_weight.shape[1] != in_dim:
        raise ValueError("proj_weight in_features must equal Dv * concat_factor")

    out_dtype = image_hidden_states.dtype
    if compute_dtype is None:
        compute_dtype = jnp.bfloat16 if out_dtype == jnp.float32 else out_dtype
    cdtype = jnp.dtype(compute_dtype)
    ci = cdtype.itemsize
    co = jnp.dtype(out_dtype).itemsize

    # "concatenate" + row flatten: (B, S, Dv) -> (M, K), row-major (== torch.reshape).
    # The f32 -> bf16 cast rides the same relayout copy, so it adds no extra pass.
    m = bsz * new_seq
    x2d = image_hidden_states.astype(cdtype).reshape(m, in_dim)

    # One-time weight prep: transpose to (K, N) so the kernel is a plain MXU
    # matmul (no in-kernel weight transposes), cast to the compute dtype, and pad
    # N to a lane-dense multiple of 128 only when unaligned (real text hidden
    # sizes are aligned, so the hot path pays nothing extra beyond the cast).
    # TODO(synk): a real model should store the projection weight pre-transposed /
    # pre-cast so this per-call weight pass disappears entirely.
    n_pad = _round_up(out_dim, 128)
    w_kn = proj_weight.T.astype(cdtype)
    if n_pad != out_dim:
        w_kn = jnp.pad(w_kn, ((0, 0), (0, n_pad - out_dim)))

    vmem_limit = int(_vmem_budget_bytes())
    block_budget = max(vmem_limit - (6 << 20), 8 << 20)   # headroom for internals
    tm, tn = _choose_tiles(m, n_pad, in_dim, ci, co, block_budget)
    grid = (pl.cdiv(m, tm), pl.cdiv(n_pad, tn))
    num_m_tiles = (m + tm - 1) // tm

    # Truthful HBM traffic: activations once, weight re-read per M tile, output once.
    cost = pl.CostEstimate(
        flops=2 * m * in_dim * n_pad,
        transcendentals=0,
        bytes_accessed=(m * in_dim * ci
                        + num_m_tiles * n_pad * in_dim * ci
                        + m * n_pad * co),
    )

    out_padded = pl.pallas_call(
        _proj_kernel,
        out_shape=jax.ShapeDtypeStruct((m, n_pad), out_dtype),
        grid_spec=pltpu.PrefetchScalarGridSpec(
            num_scalar_prefetch=0,
            grid=grid,
            in_specs=[
                # Activations: block index changes only on the outer M axis, so the
                # (tm, K) slab is DMA'd once per M tile (once per call when tm >= M).
                pl.BlockSpec((tm, in_dim), lambda i, j: (i, 0)),
                # Weight in (K, N) layout, streamed lane-dense over the inner N axis.
                pl.BlockSpec((in_dim, tn), lambda i, j: (0, j)),
            ],
            out_specs=pl.BlockSpec((tm, tn), lambda i, j: (i, j)),
        ),
        compiler_params=pltpu.CompilerParams(
            dimension_semantics=("parallel", "parallel"),
            vmem_limit_bytes=vmem_limit,
        ),
        cost_estimate=cost,
    )(x2d, w_kn)

    out2d = out_padded if n_pad == out_dim else out_padded[:, :out_dim]
    return out2d.reshape(bsz, new_seq, out_dim)


if __name__ == "__main__":
    # Small, self-consistent shapes:
    #   vision hidden = 32, concat_factor = 3 -> proj input = 96
    #   text hidden (output) = 64
    #   batch = 2, seq = 12 (divisible by concat_factor)
    B, S, DV = 2, 12, 32
    CONCAT = 3
    DOUT = 64

    key = jax.random.PRNGKey(0)
    k_x, k_w = jax.random.split(key)
    image_hidden_states = jax.random.normal(k_x, (B, S, DV), dtype=jnp.float32)
    # Deterministic synthetic weight in PyTorch nn.Linear layout (out, in).
    proj_weight = (
        jax.random.normal(k_w, (DOUT, DV * CONCAT), dtype=jnp.float32)
        / jnp.sqrt(DV * CONCAT)
    )

    out = detikzify_connector(image_hidden_states, proj_weight, concat_factor=CONCAT)
    jax.block_until_ready(out)

    # Reference (same math as the PyTorch module).  The kernel computes in bf16
    # operands with f32 accumulation, so compare against the bf16-rounded-input
    # reference computed at highest precision.
    xr = image_hidden_states.astype(jnp.bfloat16).astype(jnp.float32)
    wr = proj_weight.astype(jnp.bfloat16).astype(jnp.float32)
    ref = jnp.einsum(
        "btk,nk->btn",
        xr.reshape(B, S // CONCAT, DV * CONCAT),
        wr,
        precision=lax.Precision.HIGHEST,
    )
    assert out.shape == (B, S // CONCAT, DOUT)
    assert out.dtype == image_hidden_states.dtype
    err = float(jnp.max(jnp.abs(out - ref)))
    assert jnp.allclose(out, ref, atol=2e-3, rtol=2e-3), err

    print("KERNEL_OK")
</pallas_src>

<mosaic_0001>
module attributes {stable_mosaic.version = 11 : i64} {
  func.func @_proj_kernel(%arg0: i32, %arg1: i32, %arg2: memref<16x96xbf16, #tpu.memory_space<vmem>>, %arg3: memref<96x128xbf16, #tpu.memory_space<vmem>>, %arg4: memref<16x128xf32, #tpu.memory_space<vmem>>) attributes {dimension_semantics = [#tpu.dimension_semantics<parallel>, #tpu.dimension_semantics<parallel>], iteration_bounds = array<i64: 1, 1>, scalar_prefetch = 0 : i64, scratch_operands = 0 : i64, tpu.core_type = #tpu.core_type<tc>, window_params = [{transform_indices = @transform_0, window_bounds = array<i64: 16, 96>}, {transform_indices = @transform_1, window_bounds = array<i64: 96, 128>}, {transform_indices = @transform_2, window_bounds = array<i64: 16, 128>}]} {
    %c0 = arith.constant 0 : index
    %c0_0 = arith.constant 0 : index
    %0 = vector.load %arg2[%c0, %c0_0] : memref<16x96xbf16, #tpu.memory_space<vmem>>, vector<16x96xbf16>
    %c0_1 = arith.constant 0 : index
    %c0_2 = arith.constant 0 : index
    %1 = vector.load %arg3[%c0_1, %c0_2] : memref<96x128xbf16, #tpu.memory_space<vmem>>, vector<96x128xbf16>
    %cst = arith.constant dense<0.000000e+00> : vector<16x128xf32>
    %2 = tpu.matmul %0, %1, %cst {dimension_numbers = #tpu.dot_dimension_numbers<[1], [0], [0], [1], [0, 0, 1, 1], [], []>} : vector<16x96xbf16>, vector<96x128xbf16>, vector<16x128xf32> -> vector<16x128xf32>
    %c0_3 = arith.constant 0 : index
    %c0_4 = arith.constant 0 : index
    %3 = vector.load %arg4[%c0_3, %c0_4] : memref<16x128xf32, #tpu.memory_space<vmem>>, vector<16x128xf32>
    tpu.vector_store %arg4[%c0_3, %c0_4], %2 {strides = array<i32>} : memref<16x128xf32, #tpu.memory_space<vmem>>, vector<16x128xf32>,
    return
  }
  func.func @transform_0(%arg0: i32, %arg1: i32) -> (i32, i32) {
    %c0_i32 = arith.constant 0 : i32
    %c0_i32_0 = arith.constant 0 : i32
    return %arg0, %c0_i32 : i32, i32
  }
  func.func @transform_1(%arg0: i32, %arg1: i32) -> (i32, i32) {
    %c0_i32 = arith.constant 0 : i32
    %c0_i32_0 = arith.constant 0 : i32
    return %c0_i32, %arg1 : i32, i32
  }
  func.func @transform_2(%arg0: i32, %arg1: i32) -> (i32, i32) {
    %c0_i32 = arith.constant 0 : i32
    return %arg0, %arg1 : i32, i32
  }
}

</mosaic_0001>

<bundles_post_ra>
// kernel: detikzify_connector.1
= control target key start
LH: loop header
LB: loop body
LE: loop exit
PB: predicated region body
PF: predicated region fallthrough
CT: control target
= control target key end

     0   :  { %7 = vsyncpa [#allocation3], 0  ;;  %v196_v1 = vmov 0.0   ;;  %vm197_vm0 = vmmov 0   ;;  %vm68_vm1 = vcmask 785408   ;;  %s240_s0 = inlined_call_operand.vmem [shape: bf16[8,96], index: 0, kind: input, shape index: {}]   ;;  %s241_s1 = inlined_call_operand.vmem [shape: bf16[96,128], index: 1, kind: input, shape index: {}]   ;;  %s242_s2 = inlined_call_operand.hbm [shape: f32[8,128], index: 2, kind: output, shape index: {}]  }
   0x1   :  { %v167_v0 = vld [vmem:[%s241_s1 + $0x28] sm:$0xff]   ;;  %146 = vmatprep.subr.bf16.mxu0 %v196_v1  ;;  %v168_v2 = vld [vmem:[%s241_s1 + $0x20] sm:$0xff]   ;;  %158 = vmatprep.mubr.msk.bf16.mxu0 %vm197_vm0, %v196_v1  ;;  %v169_v3 = vld [vmem:[%s241_s1 + $0x18] sm:$0xff]  }
   0x2   :  { %147 = vmatpush3.bf16.msra.mxu0 %v167_v0  ;;  %v170_v4 = vld [vmem:[%s241_s1 + $0x10] sm:$0xff]   ;;  %v171_v5 = vld [vmem:[%s241_s1 + $0x8] sm:$0xff]   ;;  %v172_v6 = vld [vmem:[%s241_s1] sm:$0xff]  }
   0x3   :  { %148 = vmatprep.subr.bf16.mxu0 %v196_v1  ;;  %v173_v7 = vld [vmem:[%s240_s0] sm:$0xff]  }
   0x6   :  { %149 = vmatpush3.bf16.msra.mxu0 %v168_v2 }
   0x7   :  { %150 = vmatprep.subr.bf16.mxu0 %v196_v1 }
   0xa   :  { %151 = vmatpush3.bf16.msra.mxu0 %v169_v3 }
   0xb   :  { %152 = vmatprep.subr.bf16.mxu0 %v196_v1 }
   0xe   :  { %153 = vmatpush3.bf16.msra.mxu0 %v170_v4 }
   0xf   :  { %154 = vmatprep.subr.bf16.mxu0 %v196_v1 }
  0x12   :  { %155 = vmatpush3.bf16.msra.mxu0 %v171_v5 }
  0x13   :  { %156 = vmatprep.subr.bf16.mxu0 %v196_v1 }
  0x16   :  { %157 = vmatpush3.bf16.msra.mxu0 %v172_v6 }
  0x19   :  { %159 = vmatmul.mubr.msk.bf16.vlgmr.msra.gmra.mxu0 %vm68_vm1, %v173_v7 }
  0xd9   :  { %v106_v8 = vpop.f32.mrf.mxu0 }
  0xda   :  { %113 = vst [vmem:[#allocation2] sm:$0xff] %v106_v8 }
  0xdb   :  { %v160_v9 = vpop.f32.mrf.mxu0 }
  0xdd   :  { %v109_v10 = vpop.f32.mrf.mxu0 }
  0xde   :  { %114 = vst [vmem:[#allocation2 + $0x8] sm:$0xff] %v109_v10 }
  0xdf   :  { %v161_v11 = vpop.f32.mrf.mxu0 }
  0xe0   :  { %119 = vsyncadd [#allocation3], 128  ;;  %s198_s23 = smov [#allocation2]  }
  0xe1   :  { %s120_s24 = sshll.u32 %s198_s23, 4  ;;  %s121_s24 = int_to_ptr.vmem [resolvable:$true] %s120_s24 }
  0xe2   :  { %s174_s25 = scalar_lea.vmem %s121_s24, 128  ;;  %s178_s1 = scalar_lea.vmem %s121_s24, 256 }
  0xe3   :  { %p175_p0 = scmp.ne.s32.totalorder %s121_s24, %s174_s25  ;;  %p179_p1 = scmp.lt.s32.totalorder %s121_s24, %s121_s24 }
  0xe4   :  { %p180_p2 = scmp.lt.s32.totalorder %s178_s1, %s174_s25 }
  0xe6   :  { %p181_p3 = por %p180_p2, %p179_p1 }
  0xe8   :  { %p182_p4 = pnand %p181_p3, %p175_p0 }
  0xea   :  { %185 = shalt.err (!%p182_p4)
}
  0xeb   :  { %s199_s0 = smov 128   ;;  %s200_s26 = smov 8  }
  0xec   :  { %126 = dma.vmem_to_hbm [thread:$0]  %s121_s24, 128, %s242_s2, [#allocation3], %s199_s0, %s199_s0, %s200_s26  }
  0xed   :  { %194 = dma.done.wait [#allocation3], 256  }
  0xee   :  { %195 = vsyncadd [#allocation3], 4294967040 }
  0xef   :  { %130 = vsyncpa [#allocation3], 1 }

</bundles_post_ra>
